<compile_context>
chip_gen: v7x
topology: tpu7x:2x2x1
jax: 0.10.0
libtpu: 0.0.40
codegen_flags: <defaults>
</compile_context>

<pallas_src>
import functools

import jax
import jax.numpy as jnp
from jax import lax
from jax.experimental import pallas as pl
from jax.experimental.pallas import tpu as pltpu

K = 3  # MaxPool2d(3): kernel=stride=3, padding=0, dilation=1, ceil_mode=True


def _round_up(a, b):
    return -(-a // b) * b


def _maxpool3x3_kernel(x_ref, sel_ref, o_ref):
    # x_ref:   (BR, 3, WP)  -- BR row-groups of 3 input rows, W on lanes
    # sel_ref: (3, WP, OW)  -- f32 one-hot column-selection matrices (resident)
    # o_ref:   (BR, OW)
    x = x_ref[...]
    # Pool across the 3 H rows of each window (tiny sublane-axis reduce).
    h = jnp.max(x, axis=1).astype(jnp.float32)                    # (BR, WP)
    # Pool across the 3 W columns and compact stride-3 lanes in one shot:
    # p_k[:, j] = h[:, 3j + k] via exact one-hot matmuls (MXU has huge slack
    # in this HBM-bound kernel), then elementwise max on the VPU.
    p = jnp.dot(h, sel_ref[0], preferred_element_type=jnp.float32)
    p = jnp.maximum(p, jnp.dot(h, sel_ref[1], preferred_element_type=jnp.float32))
    p = jnp.maximum(p, jnp.dot(h, sel_ref[2], preferred_element_type=jnp.float32))
    o_ref[...] = p.astype(o_ref.dtype)


@functools.partial(jax.jit, static_argnames=("block_bytes",))
def maxpool2d_ceil(x, *, block_bytes=6 * 1024 * 1024):
    """MaxPool2d(kernel_size=3, stride=3, padding=0, ceil_mode=True), NCHW."""
    n, c, h, w = x.shape
    oh = -(-h // K)            # ceil_mode output sizes
    ow = -(-w // K)
    hp, wp = oh * K, ow * K
    dt = x.dtype
    itemsize = jnp.dtype(dt).itemsize

    # ceil_mode: out-of-bounds window elements must never win the max.
    # Use the dtype's own minimum (not -inf) so the selection matmul never
    # sees 0 * inf, and so integer dtypes get a valid pad constant.
    if jnp.issubdtype(dt, jnp.floating):
        pad_val = float(jnp.finfo(dt).min)
    else:
        pad_val = int(jnp.iinfo(dt).min)
        # TODO(synk): for wide integer dtypes the f32 selection matmul is only
        # exact for |x| < 2**24; a roll/strided-select path would be needed.
    if hp != h or wp != w:
        x = jnp.pad(x, ((0, 0), (0, 0), (0, hp - h), (0, wp - w)),
                    constant_values=pad_val)

    # Contiguous (free) reshape: each output row's 3 source rows form a
    # leading-dim group; W stays the minor (lane) axis.  No transpose.
    rows = n * c * oh
    xr = x.reshape(rows, K, wp)

    # One-hot lane-selection matrices for the stride-3 column pooling.
    lane_ids = jnp.arange(wp, dtype=jnp.int32)[:, None]            # (wp, 1)
    col_ids = jnp.arange(ow, dtype=jnp.int32)[None, :]             # (1, ow)
    sel = jnp.stack(
        [(lane_ids == K * col_ids + kk) for kk in range(K)], axis=0
    ).astype(jnp.float32)                                          # (3, wp, ow)

    # Row-block size: largest block whose sublane/lane-padded VMEM footprint
    # fits the budget, a multiple of the dtype's sublane quantum, and small
    # enough to leave >= 2 grid steps (v7x megacore) when possible.
    sub = max(8, 32 // itemsize)            # 8 f32, 16 bf16, 32 int8/fp8
    lane_padded = _round_up(wp, 128)
    slab_bytes = 8 * lane_padded * itemsize  # padded VMEM for one (3, wp) group
    if rows <= sub:
        br = rows                            # block dims == full dims
    else:
        br_budget = max(sub, (block_bytes // slab_bytes) // sub * sub)
        br = min(br_budget, _round_up(-(-rows // 2), sub))
    grid = (pl.cdiv(rows, br),)

    out = pl.pallas_call(
        _maxpool3x3_kernel,
        out_shape=jax.ShapeDtypeStruct((rows, ow), dt),
        grid=grid,
        in_specs=[
            pl.BlockSpec((br, K, wp), lambda i: (i, 0, 0)),
            pl.BlockSpec((K, wp, ow), lambda i: (0, 0, 0)),  # constant -> resident
        ],
        out_specs=pl.BlockSpec((br, ow), lambda i: (i, 0)),
        compiler_params=pltpu.CompilerParams(
            dimension_semantics=("parallel",),
            vmem_limit_bytes=32 * 1024 * 1024,
        ),
    )(xr, sel)

    return out.reshape(n, c, oh, ow)


if __name__ == "__main__":
    key = jax.random.PRNGKey(0)
    x = jax.random.normal(key, (2, 4, 16, 16), dtype=jnp.float32)

    y = jax.block_until_ready(maxpool2d_ceil(x))

    # Independent reference: lax.reduce_window pads with its init value (-inf),
    # matching PyTorch's ceil_mode handling of out-of-bounds window elements.
    ref = lax.reduce_window(
        x,
        -jnp.inf,
        lax.max,
        window_dimensions=(1, 1, 3, 3),
        window_strides=(1, 1, 3, 3),
        padding=((0, 0), (0, 0), (0, 2), (0, 2)),
    )

    assert y.shape == (2, 4, 6, 6), y.shape
    assert jnp.allclose(y, ref), "Pallas maxpool mismatch vs lax.reduce_window"
    print("KERNEL_OK")
</pallas_src>

<mosaic_0001>
module attributes {stable_mosaic.version = 11 : i64} {
  func.func @_maxpool3x3_kernel(%arg0: i32, %arg1: memref<24x3x18xf32, #tpu.memory_space<vmem>>, %arg2: memref<3x18x6xf32, #tpu.memory_space<vmem>>, %arg3: memref<24x6xf32, #tpu.memory_space<vmem>>) attributes {dimension_semantics = [#tpu.dimension_semantics<parallel>], iteration_bounds = array<i64: 2>, scalar_prefetch = 0 : i64, scratch_operands = 0 : i64, tpu.core_type = #tpu.core_type<tc>, window_params = [{transform_indices = @transform_0, window_bounds = array<i64: 24, 3, 18>}, {pipeline_mode = #tpu.pipeline_mode<synchronous>, transform_indices = @transform_1, window_bounds = array<i64: 3, 18, 6>}, {transform_indices = @transform_2, window_bounds = array<i64: 24, 6>}]} {
    %c0 = arith.constant 0 : index
    %c0_0 = arith.constant 0 : index
    %c0_1 = arith.constant 0 : index
    %0 = vector.load %arg1[%c0, %c0_0, %c0_1] : memref<24x3x18xf32, #tpu.memory_space<vmem>>, vector<24x3x18xf32>
    %cst = arith.constant dense<0xFF800000> : vector<24x18xf32>
    %1 = vector.multi_reduction <maximumf>, %0, %cst [1] : vector<24x3x18xf32> to vector<24x18xf32>
    %c0_2 = arith.constant 0 : index
    %c0_3 = arith.constant 0 : index
    %c0_4 = arith.constant 0 : index
    %2 = vector.load %arg2[%c0_2, %c0_3, %c0_4] : memref<3x18x6xf32, #tpu.memory_space<vmem>>, vector<1x18x6xf32>
    %3 = vector.shape_cast %2 : vector<1x18x6xf32> to vector<18x6xf32>
    %cst_5 = arith.constant dense<0.000000e+00> : vector<24x6xf32>
    %4 = tpu.matmul %1, %3, %cst_5 {dimension_numbers = #tpu.dot_dimension_numbers<[1], [0], [0], [1], [0, 0, 1, 1], [], []>} : vector<24x18xf32>, vector<18x6xf32>, vector<24x6xf32> -> vector<24x6xf32>
    %c1 = arith.constant 1 : index
    %c0_6 = arith.constant 0 : index
    %c0_7 = arith.constant 0 : index
    %5 = vector.load %arg2[%c1, %c0_6, %c0_7] : memref<3x18x6xf32, #tpu.memory_space<vmem>>, vector<1x18x6xf32>
    %6 = vector.shape_cast %5 : vector<1x18x6xf32> to vector<18x6xf32>
    %cst_8 = arith.constant dense<0.000000e+00> : vector<24x6xf32>
    %7 = tpu.matmul %1, %6, %cst_8 {dimension_numbers = #tpu.dot_dimension_numbers<[1], [0], [0], [1], [0, 0, 1, 1], [], []>} : vector<24x18xf32>, vector<18x6xf32>, vector<24x6xf32> -> vector<24x6xf32>
    %8 = arith.maximumf %4, %7 : vector<24x6xf32>
    %c2 = arith.constant 2 : index
    %c0_9 = arith.constant 0 : index
    %c0_10 = arith.constant 0 : index
    %9 = vector.load %arg2[%c2, %c0_9, %c0_10] : memref<3x18x6xf32, #tpu.memory_space<vmem>>, vector<1x18x6xf32>
    %10 = vector.shape_cast %9 : vector<1x18x6xf32> to vector<18x6xf32>
    %cst_11 = arith.constant dense<0.000000e+00> : vector<24x6xf32>
    %11 = tpu.matmul %1, %10, %cst_11 {dimension_numbers = #tpu.dot_dimension_numbers<[1], [0], [0], [1], [0, 0, 1, 1], [], []>} : vector<24x18xf32>, vector<18x6xf32>, vector<24x6xf32> -> vector<24x6xf32>
    %12 = arith.maximumf %8, %11 : vector<24x6xf32>
    %c0_12 = arith.constant 0 : index
    %c0_13 = arith.constant 0 : index
    %13 = vector.load %arg3[%c0_12, %c0_13] : memref<24x6xf32, #tpu.memory_space<vmem>>, vector<24x6xf32>
    tpu.vector_store %arg3[%c0_12, %c0_13], %12 {strides = array<i32>} : memref<24x6xf32, #tpu.memory_space<vmem>>, vector<24x6xf32>,
    return
  }
  func.func @transform_0(%arg0: i32) -> (i32, i32, i32) {
    %c0_i32 = arith.constant 0 : i32
    %c0_i32_0 = arith.constant 0 : i32
    %c0_i32_1 = arith.constant 0 : i32
    return %arg0, %c0_i32, %c0_i32_0 : i32, i32, i32
  }
  func.func @transform_1(%arg0: i32) -> (i32, i32, i32) {
    %c0_i32 = arith.constant 0 : i32
    %c0_i32_0 = arith.constant 0 : i32
    %c0_i32_1 = arith.constant 0 : i32
    %c0_i32_2 = arith.constant 0 : i32
    return %c0_i32, %c0_i32_0, %c0_i32_1 : i32, i32, i32
  }
  func.func @transform_2(%arg0: i32) -> (i32, i32) {
    %c0_i32 = arith.constant 0 : i32
    %c0_i32_0 = arith.constant 0 : i32
    return %arg0, %c0_i32 : i32, i32
  }
}

</mosaic_0001>

<bundles_post_ra>
// kernel: maxpool2d_ceil.1
= control target key start
LH: loop header
LB: loop body
LE: loop exit
PB: predicated region body
PF: predicated region fallthrough
CT: control target
= control target key end

     0   :  { %s866_s9 = smov 0   ;;  %s1048_s0 = inlined_call_operand.vmem [shape: f32[48,3,18], index: 0, kind: input, shape index: {}]   ;;  %s1049_s1 = inlined_call_operand.vmem [shape: f32[3,18,6], index: 1, kind: input, shape index: {}]   ;;  %s1050_s2 = inlined_call_operand.vmem [shape: f32[48,6], index: 2, kind: output, shape index: {}]  }
   0x1 LB: > { %s726_s10 = sadd.s32 4294967295, %s846_s9   ;;  %p730_p0 = scmp.ge.s32.totalorder %s846_s9, 1  ;;  %s846_s9 = sphi %s866_s9, %s12_s9  }
   0x2   : > { %p113_p1 = scmp.lt.s32.totalorder %s846_s9, 3 }
   0x4   : > { %p114_p2 = pnand %p730_p0, %p113_p1 }
   0x5   : > { %v340_v0 = vld [vmem:[%s1049_s1] sm:$0xff] (!%p114_p2)  ;;  %v341_v1 = vld [vmem:[%s1049_s1 + $0x8] sm:$0xff] (!%p114_p2)  ;;  %v848_v2 = vmov (!%p114_p2), 0.0|0.0   ;;  %s135_s15 = smul.u32 (!%p114_p2), 24, %s726_s10  ;;  %vm849_vm0 = vmmov (!%p114_p2), 0   ;;  %v850_v4 = vmov (!%p114_p2), 0.0  }
   0x6   : > { %117 = sbr.rel (%p114_p2) target bundleno = 298 (0x12a), region = 28  ;;  %816 = vmatprep.subr.bf16.mxu0 (!%p114_p2), %v848_v2  ;;  %825 = vmatprep.subr.bf16.mxu1 (!%p114_p2), %v848_v2  ;;  %v817_v3 = vpack.c.bf16 (!%p114_p2), %v341_v1, %v340_v0  ;;  %v342_v5 = vld [vmem:[%s1049_s1 + $0x10] sm:$0x3] (!%p114_p2)  ;;  %vm402_vm1 = vcmask (!%p114_p2), 1041408   ;;  %v896_v6 = vld [vmem:[%s1049_s1 + $0x18] sm:$0xff] (!%p114_p2)  ;;  %vm171_vm2 = vcmask (!%p114_p2), 141312  }
   0x7   : > { %777 = vmatprep.mubr.msk.f32.mxu0 (!%p114_p2), %vm849_vm0, %v850_v4  ;;  %783 = vmatprep.mubr.msk.f32.mxu1 (!%p114_p2), %vm849_vm0, %v850_v4  ;;  %p136_p3 = scmp.lt.s32.totalorder (!%p114_p2), %s135_s15, 47  ;;  %v906_v7 = vld [vmem:[%s1049_s1 + $0x20] sm:$0xff] (!%p114_p2)  ;;  %v911_v8 = vld [vmem:[%s1049_s1 + $0x30] sm:$0xff] (!%p114_p2)  ;;  %v916_v9 = vld [vmem:[%s1049_s1 + $0x38] sm:$0xff] (!%p114_p2)  ;;  %vm367_vm3 = vcmask (!%p114_p2), 1041409   ;;  %vm369_vm4 = vcmask (!%p114_p2), 1042434  }
   0x8   : > { %818 = vmatpush3.bf16.msra.mxu0 (!%p114_p2), %v817_v3  ;;  %827 = vmatpush3.bf16.msra.mxu1 (!%p114_p2), %v817_v3  ;;  %v820_v19 = vpack.c.bf16 (!%p114_p2), %v906_v7, %v896_v6  ;;  %v823_v20 = vpack.c.bf16 (!%p114_p2), %v916_v9, %v911_v8  ;;  %vm371_vm5 = vcmask (!%p114_p2), 1043459   ;;  %vm373_vm6 = vcmask (!%p114_p2), 1044484   ;;  %s141_s6 = smul.u32 (!%p114_p2), 3, %s726_s10 }
   0x9   : > { %775 = vmatprep.subr.mxu0 (!%p114_p2), %v850_v4  ;;  %826 = vmatprep.subr.mxu1 (!%p114_p2), %v850_v4  ;;  %vm375_vm7 = vcmask (!%p114_p2), 1045509   ;;  %vm377_vm8 = vcmask (!%p114_p2), 1046534   ;;  %vm379_vm9 = vcmask (!%p114_p2), 1047559   ;;  %vm395_vm10 = vcmask (!%p114_p2), 146432  }
   0xa   : > { %p142_p4 = scmp.lt.s32.totalorder (!%p114_p2), %s141_s6, 5  ;;  %vm666_vm11 = vcmask (!%p114_p2), 48128  }
   0xc   : > { %776 = vmatpush3.msk.msra.mxu0 (!%p114_p2), %vm402_vm1, %v342_v5  ;;  %828 = vmatpush3.msk.msra.mxu1 (!%p114_p2), %vm402_vm1, %v342_v5 }
   0xd   : > { %s1052_s15 = smov (!%p136_p3, %s135_s15), 47  ;;  %819 = vmatprep.subr.bf16.mxu1 %v848_v2  ;;  %822 = vmatprep.subr.bf16.mxu0 %v848_v2  ;;  %s1054_s6 = smov (!%p142_p4, %s141_s6), 5 }
   0xe   : > { %s731_s18 = sshll.u32 %s1052_s15, 2  ;;  %s732_s7 = sshll.u32 %s1054_s6, 3 }
   0xf   : > { %s901_s23 = scalar_lea.vmem %s1048_s0, %s731_s18  ;;  %s145_s12 = scalar_lea.vmem %s1050_s2, %s732_s7 }
  0x10   : > { %v147_v10 = vld [vmem:[%s901_s23] sm:$0x7]  ;;  %v148_v11 = vld [vmem:[%s901_s23 + $0x4] sm:$0x7]  ;;  %v149_v12 = vld [vmem:[%s901_s23 + $0x8] sm:$0x7] }
  0x11   : > { %v150_v13 = vld [vmem:[%s901_s23 + $0xc] sm:$0x7]  ;;  %v151_v14 = vld [vmem:[%s901_s23 + $0x10] sm:$0x7]  ;;  %v152_v15 = vld [vmem:[%s901_s23 + $0x14] sm:$0x7] }
  0x12   : > { %v153_v16 = vld [vmem:[%s901_s23 + $0x18] sm:$0x7]  ;;  %v172_v17 = vsel %vm171_vm2, %v147_v10, -inf  ;;  %v179_v18 = vsel %vm171_vm2, %v148_v11, -inf  ;;  %v154_v21 = vld [vmem:[%s901_s23 + $0x1c] sm:$0x7] }
  0x13   : > { %v173_v22 = vrot.slane %v172_v17, 4  ;;  %v180_v23 = vrot.slane %v179_v18, 4  ;;  %v186_v24 = vsel %vm171_vm2, %v149_v12, -inf  ;;  %v193_v25 = vsel %vm171_vm2, %v150_v13, -inf  ;;  %v163_v62 = vld [vmem:[%s901_s23 + $0x40] sm:$0x7] }
  0x14   : > { %v187_v26 = vrot.slane %v186_v24, 4  ;;  %v194_v27 = vrot.slane %v193_v25, 4  ;;  %v200_v28 = vsel %vm171_vm2, %v151_v14, -inf  ;;  %v207_v29 = vsel %vm171_vm2, %v152_v15, -inf  ;;  %v164_v12 = vld [vmem:[%s901_s23 + $0x44] sm:$0x7] }
  0x15   : > { %v174_v30 = vmax.f32 %v172_v17, %v173_v22  ;;  %v181_v31 = vmax.f32 %v179_v18, %v180_v23  ;;  %v201_v32 = vrot.slane %v200_v28, 4  ;;  %v208_v33 = vrot.slane %v207_v29, 4  ;;  %v165_v13 = vld [vmem:[%s901_s23 + $0x48] sm:$0x7]  ;;  %v166_v14 = vld [vmem:[%s901_s23 + $0x4c] sm:$0x7] }
  0x16   : > { %v188_v34 = vmax.f32 %v186_v24, %v187_v26  ;;  %v195_v35 = vmax.f32 %v193_v25, %v194_v27  ;;  %v214_v36 = vsel %vm171_vm2, %v153_v16, -inf  ;;  %v221_v37 = vsel %vm171_vm2, %v154_v21, -inf  ;;  %v167_v24 = vld [vmem:[%s901_s23 + $0x50] sm:$0x7]  ;;  %v168_v27 = vld [vmem:[%s901_s23 + $0x54] sm:$0x7] }
  0x17   : > { %v175_v38 = vrot.slane %v174_v30, 2  ;;  %v182_v39 = vrot.slane %v181_v31, 2  ;;  %v202_v40 = vmax.f32 %v200_v28, %v201_v32  ;;  %v209_v41 = vmax.f32 %v207_v29, %v208_v33  ;;  %v155_v9 = vld [vmem:[%s901_s23 + $0x20] sm:$0x7] }
  0x18   : > { %v189_v42 = vrot.slane %v188_v34, 2  ;;  %v196_v43 = vrot.slane %v195_v35, 2  ;;  %v215_v44 = vrot.slane %v214_v36, 4  ;;  %v222_v45 = vrot.slane %v221_v37, 4 }
  0x19   : > { %v176_v46 = vmax.f32 %v174_v30, %v175_v38  ;;  %v183_v47 = vmax.f32 %v181_v31, %v182_v39  ;;  %v203_v48 = vrot.slane %v202_v40, 2  ;;  %v210_v49 = vrot.slane %v209_v41, 2 }
  0x1a   : > { %v190_v50 = vmax.f32 %v188_v34, %v189_v42  ;;  %v197_v51 = vmax.f32 %v195_v35, %v196_v43  ;;  %v216_v52 = vmax.f32 %v214_v36, %v215_v44  ;;  %v223_v53 = vmax.f32 %v221_v37, %v222_v45  ;;  %v169_v36 = vld [vmem:[%s901_s23 + $0x58] sm:$0x7]  ;;  %v170_v45 = vld [vmem:[%s901_s23 + $0x5c] sm:$0x7] }
  0x1b   : > { %v177_v54 = vrot.slane %v176_v46, 1  ;;  %v184_v55 = vrot.slane %v183_v47, 1  ;;  %v204_v56 = vmax.f32 %v202_v40, %v203_v48  ;;  %v211_v57 = vmax.f32 %v209_v41, %v210_v49 }
  0x1c   : > { %v191_v58 = vrot.slane %v190_v50, 1  ;;  %v198_v59 = vrot.slane %v197_v51, 1  ;;  %v217_v60 = vrot.slane %v216_v52, 2  ;;  %v224_v61 = vrot.slane %v223_v53, 2 }
  0x1d   : > { %v178_v63 = vmax.f32 %v176_v46, %v177_v54  ;;  %v185_v0 = vmax.f32 %v183_v47, %v184_v55  ;;  %v205_v1 = vrot.slane %v204_v56, 1  ;;  %v212_v2 = vrot.slane %v211_v57, 1 }
  0x1e   : > { %v192_v3 = vmax.f32 %v190_v50, %v191_v58  ;;  %v199_v5 = vmax.f32 %v197_v51, %v198_v59  ;;  %v218_v10 = vmax.f32 %v216_v52, %v217_v60  ;;  %v225_v11 = vmax.f32 %v223_v53, %v224_v61  ;;  %v746_v61 = vld [vmem:[%s1049_s1 + $0x40] sm:$0x3] }
  0x1f   : > { %v206_v15 = vmax.f32 %v204_v56, %v205_v1  ;;  %v213_v16 = vmax.f32 %v211_v57, %v212_v2  ;;  %v368_v17 = vsel %vm367_vm3, %v185_v0, %v178_v63  ;;  %v284_v18 = vsel %vm171_vm2, %v163_v62, -inf }
  0x20   : > { %v219_v21 = vrot.slane %v218_v10, 1  ;;  %v226_v22 = vrot.slane %v225_v11, 1  ;;  %v370_v23 = vsel %vm369_vm4, %v192_v3, %v368_v17  ;;  %v285_v25 = vrot.slane %v284_v18, 4  ;;  %v157_v17 = vld [vmem:[%s901_s23 + $0x28] sm:$0x7] }
  0x21   : > { %v372_v26 = vsel %vm371_vm5, %v199_v5, %v370_v23  ;;  %v291_v28 = vsel %vm171_vm2, %v164_v12, -inf  ;;  %v298_v29 = vsel %vm171_vm2, %v165_v13, -inf  ;;  %v305_v30 = vsel %vm171_vm2, %v166_v14, -inf }
  0x22   : > { %v220_v31 = vmax.f32 %v218_v10, %v219_v21  ;;  %v227_v32 = vmax.f32 %v225_v11, %v226_v22  ;;  %v374_v33 = vsel %vm373_vm6, %v206_v15, %v372_v26  ;;  %v286_v34 = vmax.f32 %v284_v18, %v285_v25 }
  0x23   : > { %v376_v35 = vsel %vm375_vm7, %v213_v16, %v374_v33  ;;  %v292_v37 = vrot.slane %v291_v28, 4  ;;  %v299_v38 = vrot.slane %v298_v29, 4  ;;  %v306_v39 = vrot.slane %v305_v30, 4  ;;  %v156_v16 = vld [vmem:[%s901_s23 + $0x24] sm:$0x7] }
  0x24   : > { %v378_v40 = vsel %vm377_vm8, %v220_v31, %v376_v35  ;;  %v287_v41 = vrot.slane %v286_v34, 2  ;;  %v312_v42 = vsel %vm171_vm2, %v167_v24, -inf  ;;  %v319_v43 = vsel %vm171_vm2, %v168_v27, -inf  ;;  %v158_v31 = vld [vmem:[%s901_s23 + $0x2c] sm:$0x7] }
  0x25   : > { %v958_v44 = vsel %vm379_vm9, %v227_v32, %v378_v40  ;;  %v293_v46 = vmax.f32 %v291_v28, %v292_v37  ;;  %v300_v47 = vmax.f32 %v298_v29, %v299_v38  ;;  %v307_v48 = vmax.f32 %v305_v30, %v306_v39  ;;  %v159_v40 = vld [vmem:[%s901_s23 + $0x30] sm:$0x7] }
  0x26   : > { %778 = vmatmul.mubr.msk.f32.vlgmr.msra.gmra.mrb[0].mxu0 %vm395_vm10, %v958_v44  ;;  %v288_v49 = vmax.f32 %v286_v34, %v287_v41  ;;  %v313_v50 = vrot.slane %v312_v42, 4  ;;  %v320_v51 = vrot.slane %v319_v43, 4  ;;  %v326_v52 = vsel %vm171_vm2, %v169_v36, -inf }
  0x27   : > { %v294_v53 = vrot.slane %v293_v46, 2  ;;  %v301_v54 = vrot.slane %v300_v47, 2  ;;  %v308_v55 = vrot.slane %v307_v48, 2  ;;  %v327_v56 = vrot.slane %v326_v52, 4  ;;  %824 = vmatpush3.bf16.msra.mxu0 %v823_v20  ;;  %780 = vmatprep.mubr.msk.f32.mxu0 %vm849_vm0, %v850_v4 }
  0x28   : > { %v289_v57 = vrot.slane %v288_v49, 1  ;;  %v314_v58 = vmax.f32 %v312_v42, %v313_v50  ;;  %v321_v59 = vmax.f32 %v319_v43, %v320_v51  ;;  %v333_v60 = vsel %vm171_vm2, %v170_v45, -inf  ;;  %805 = vmatprep.subr.mxu0 %v850_v4  ;;  %v161_v50 = vld [vmem:[%s901_s23 + $0x38] sm:$0x7] }
  0x29   : > { %v295_v62 = vmax.f32 %v293_v46, %v294_v53  ;;  %v302_v63 = vmax.f32 %v300_v47, %v301_v54  ;;  %v309_v0 = vmax.f32 %v307_v48, %v308_v55  ;;  %v328_v8 = vmax.f32 %v326_v52, %v327_v56 }
  0x2a   : > { %v290_v20 = vmax.f32 %v288_v49, %v289_v57  ;;  %v315_v1 = vrot.slane %v314_v58, 2  ;;  %v322_v2 = vrot.slane %v321_v59, 2  ;;  %v334_v3 = vrot.slane %v333_v60, 4  ;;  %v160_v49 = vld [vmem:[%s901_s23 + $0x34] sm:$0x7] }
  0x2b   : > { %v296_v5 = vrot.slane %v295_v62, 1  ;;  %v303_v10 = vrot.slane %v302_v63, 1  ;;  %v310_v11 = vrot.slane %v309_v0, 1  ;;  %v329_v12 = vrot.slane %v328_v8, 2  ;;  %806 = vmatpush3.msk.msra.mxu0 %vm402_vm1, %v746_v61 }
  0x2c   : > { %v316_v13 = vmax.f32 %v314_v58, %v315_v1  ;;  %v323_v14 = vmax.f32 %v321_v59, %v322_v2  ;;  %v335_v15 = vmax.f32 %v333_v60, %v334_v3  ;;  %v228_v18 = vsel %vm171_vm2, %v155_v9, -inf  ;;  %v162_v58 = vld [vmem:[%s901_s23 + $0x3c] sm:$0x7] }
  0x2d   : > { %v297_v21 = vmax.f32 %v295_v62, %v296_v5  ;;  %v304_v22 = vmax.f32 %v302_v63, %v303_v10  ;;  %v311_v23 = vmax.f32 %v309_v0, %v310_v11  ;;  %v330_v24 = vmax.f32 %v328_v8, %v329_v12 }
  0x2e   : > { %v317_v25 = vrot.slane %v316_v13, 1  ;;  %v324_v26 = vrot.slane %v323_v14, 1  ;;  %v336_v27 = vrot.slane %v335_v15, 2  ;;  %v229_v28 = vrot.slane %v228_v18, 4 }
  0x2f   : > { %v331_v29 = vrot.slane %v330_v24, 1  ;;  %v388_v30 = vsel %vm367_vm3, %v297_v21, %v290_v20  ;;  %v235_v32 = vsel %vm171_vm2, %v156_v16, -inf  ;;  %v242_v33 = vsel %vm171_vm2, %v157_v17, -inf  ;;  %v739_v17 = vld [vmem:[%s1049_s1 + $0x28] sm:$0x3] }
  0x30   : > { %v318_v34 = vmax.f32 %v316_v13, %v317_v25  ;;  %v325_v35 = vmax.f32 %v323_v14, %v324_v26  ;;  %v337_v36 = vmax.f32 %v335_v15, %v336_v27  ;;  %v389_v37 = vsel %vm369_vm4, %v304_v22, %v388_v30 }
  0x31   : > { %v332_v38 = vmax.f32 %v330_v24, %v331_v29  ;;  %v390_v39 = vsel %vm371_vm5, %v311_v23, %v389_v37  ;;  %v230_v41 = vmax.f32 %v228_v18, %v229_v28  ;;  %v236_v42 = vrot.slane %v235_v32, 4 }
  0x32   : > { %v338_v43 = vrot.slane %v337_v36, 1  ;;  %v391_v45 = vsel %vm373_vm6, %v318_v34, %v390_v39  ;;  %v243_v46 = vrot.slane %v242_v33, 4  ;;  %v249_v47 = vsel %vm171_vm2, %v158_v31, -inf }
  0x33   : > { %v392_v48 = vsel %vm375_vm7, %v325_v35, %v391_v45  ;;  %v231_v51 = vrot.slane %v230_v41, 2  ;;  %v237_v52 = vmax.f32 %v235_v32, %v236_v42  ;;  %v250_v53 = vrot.slane %v249_v47, 4 }
  0x34   : > { %v339_v54 = vmax.f32 %v337_v36, %v338_v43  ;;  %v393_v55 = vsel %vm377_vm8, %v332_v38, %v392_v48  ;;  %v244_v56 = vmax.f32 %v242_v33, %v243_v46  ;;  %v256_v57 = vsel %vm171_vm2, %v159_v40, -inf }
  0x35   : > { %v232_v59 = vmax.f32 %v230_v41, %v231_v51  ;;  %v238_v60 = vrot.slane %v237_v52, 2  ;;  %v251_v61 = vmax.f32 %v249_v47, %v250_v53  ;;  %v257_v62 = vrot.slane %v256_v57, 4 }
  0x36   : > { %v995_v63 = vsel %vm379_vm9, %v339_v54, %v393_v55  ;;  %v245_v0 = vrot.slane %v244_v56, 2  ;;  %v263_v8 = vsel %vm171_vm2, %v160_v49, -inf  ;;  %v270_v9 = vsel %vm171_vm2, %v161_v50, -inf }
  0x37   : > { %784 = vmatmul.mubr.msk.f32.vlgmr.msra.gmra.mrb[0].mxu1 %vm395_vm10, %v995_v63  ;;  %v233_v20 = vrot.slane %v232_v59, 1  ;;  %v239_v1 = vmax.f32 %v237_v52, %v238_v60  ;;  %v252_v2 = vrot.slane %v251_v61, 2  ;;  %v258_v3 = vmax.f32 %v256_v57, %v257_v62 }
  0x38   : > { %821 = vmatpush3.bf16.msra.mxu1 %v820_v19  ;;  %v246_v5 = vmax.f32 %v244_v56, %v245_v0  ;;  %v264_v10 = vrot.slane %v263_v8, 4  ;;  %v271_v11 = vrot.slane %v270_v9, 4  ;;  %v277_v12 = vsel %vm171_vm2, %v162_v58, -inf  ;;  %792 = vmatprep.mubr.msk.f32.mxu1 %vm849_vm0, %v850_v4 }
  0x39   : > { %790 = vmatprep.subr.mxu1 %v850_v4  ;;  %v234_v13 = vmax.f32 %v232_v59, %v233_v20  ;;  %v240_v14 = vrot.slane %v239_v1, 1  ;;  %v253_v15 = vmax.f32 %v251_v61, %v252_v2  ;;  %v259_v16 = vrot.slane %v258_v3, 2 }
  0x3a   : > { %v247_v6 = vrot.slane %v246_v5, 1  ;;  %v265_v7 = vmax.f32 %v263_v8, %v264_v10  ;;  %v272_v19 = vmax.f32 %v270_v9, %v271_v11  ;;  %v278_v18 = vrot.slane %v277_v12, 4 }
  0x3b   : > { %v241_v21 = vmax.f32 %v239_v1, %v240_v14  ;;  %v254_v22 = vrot.slane %v253_v15, 1  ;;  %v260_v23 = vmax.f32 %v258_v3, %v259_v16 }
  0x3c   : > { %v248_v24 = vmax.f32 %v246_v5, %v247_v6  ;;  %v266_v25 = vrot.slane %v265_v7, 2  ;;  %v273_v26 = vrot.slane %v272_v19, 2  ;;  %v279_v27 = vmax.f32 %v277_v12, %v278_v18  ;;  %791 = vmatpush3.msk.msra.mxu1 %vm402_vm1, %v739_v17 }
  0x3d   : > { %v255_v28 = vmax.f32 %v253_v15, %v254_v22  ;;  %v261_v29 = vrot.slane %v260_v23, 1  ;;  %v381_v30 = vsel %vm367_vm3, %v241_v21, %v234_v13  ;;  %793 = vmatmul.mubr.msk.f32.vlgmr.msra.gmra.mrb[2].mxu1 %vm395_vm10, %v958_v44 }
  0x3e   : > { %v267_v31 = vmax.f32 %v265_v7, %v266_v25  ;;  %v274_v32 = vmax.f32 %v272_v19, %v273_v26  ;;  %v280_v33 = vrot.slane %v279_v27, 2  ;;  %v382_v34 = vsel %vm369_vm4, %v248_v24, %v381_v30  ;;  %795 = vmatprep.mubr.msk.f32.mxu1 %vm849_vm0, %v850_v4 }
  0x3f   : > { %v262_v35 = vmax.f32 %v260_v23, %v261_v29  ;;  %v383_v36 = vsel %vm371_vm5, %v255_v28, %v382_v34 }
  0x40   : > { %v268_v37 = vrot.slane %v267_v31, 1  ;;  %v275_v38 = vrot.slane %v274_v32, 1  ;;  %v281_v39 = vmax.f32 %v279_v27, %v280_v33 }
  0x41   : > { %v384_v40 = vsel %vm373_vm6, %v262_v35, %v383_v36 }
  0x42   : > { %v269_v41 = vmax.f32 %v267_v31, %v268_v37  ;;  %v276_v42 = vmax.f32 %v274_v32, %v275_v38  ;;  %v282_v43 = vrot.slane %v281_v39, 1 }
  0x44   : > { %v283_v45 = vmax.f32 %v281_v39, %v282_v43  ;;  %v385_v46 = vsel %vm375_vm7, %v269_v41, %v384_v40 }
  0x45   : > { %v386_v47 = vsel %vm377_vm8, %v276_v42, %v385_v46 }
  0x46   : > { %v387_v48 = vsel %vm379_vm9, %v283_v45, %v386_v47 }
  0x47   : > { %781 = vmatmul.mubr.msk.f32.gmra.mrb[2].mxu0 %vm395_vm10, %v387_v48  ;;  %796 = vmatmul.mubr.msk.f32.gmra.mrb[4].mxu1 %vm395_vm10, %v387_v48 }
  0x48   : > { %807 = vmatprep.mubr.msk.f32.mxu0 %vm849_vm0, %v850_v4  ;;  %798 = vmatprep.mubr.msk.f32.mxu1 %vm849_vm0, %v850_v4 }
  0x4b   : > { %808 = vmatmul.mubr.msk.f32.vlgmr.msra.gmra.mrb[4].mxu0 %vm395_vm10, %v958_v44  ;;  %799 = vmatmul.mubr.msk.f32.gmra.mrb[6].mxu1 %vm395_vm10, %v995_v63 }
  0x4c   : > { %810 = vmatprep.mubr.msk.f32.mxu0 %vm849_vm0, %v850_v4 }
  0x4f   : > { %811 = vmatmul.mubr.msk.f32.gmra.mrb[6].mxu0 %vm395_vm10, %v387_v48 }
  0x50   : > { %813 = vmatprep.mubr.msk.f32.mxu0 %vm849_vm0, %v850_v4 }
  0x53   : > { %814 = vmatmul.mubr.msk.f32.gmra.mrb[8].mxu0 %vm395_vm10, %v995_v63 }
  0xf9   : > { %v472_v49 = vpop.f32.mrb[0].mxu0 }
  0xfa   : > { %v779_v50 = vpop.f32.mrb[1].mxu0 }
 0x10a   : > { %v482_v51 = vpop.f32.mrb[0].mxu1 }
 0x10b   : > { %v785_v52 = vpop.f32.mrb[1].mxu1 }
 0x110   : > { %v559_v44 = vpop.f32.mrb[2].mxu1 }
 0x111   : > { %v573_v53 = vmax.f32 %v472_v49, %v559_v44  ;;  %v794_v54 = vpop.f32.mrb[3].mxu1 }
 0x11a   : > { %v477_v55 = vpop.f32.mrb[2].mxu0  ;;  %v564_v56 = vpop.f32.mrb[4].mxu1 }
 0x11b   : > { %v782_v57 = vpop.f32.mrb[3].mxu0  ;;  %v574_v58 = vmax.f32 %v477_v55, %v564_v56  ;;  %v797_v4 = vpop.f32.mrb[5].mxu1 }
 0x11e   : > { %v649_v59 = vpop.f32.mrb[4].mxu0  ;;  %v569_v60 = vpop.f32.mrb[6].mxu1 }
 0x11f   : > { %v663_v61 = vmax.f32 %v573_v53, %v649_v59  ;;  %v809_v62 = vpop.f32.mrb[5].mxu0  ;;  %v575_v63 = vmax.f32 %v482_v51, %v569_v60  ;;  %v800_v0 = vpop.f32.mrb[7].mxu1 }
 0x121   : > { %667 = vst.msk [vmem:[%s145_s12] sm:$0xff] %vm666_vm11, %v663_v61 }
 0x122   : > { %v654_v8 = vpop.f32.mrb[6].mxu0 }
 0x123   : > { %v664_v9 = vmax.f32 %v574_v58, %v654_v8  ;;  %v812_v20 = vpop.f32.mrb[7].mxu0 }
 0x125   : > { %668 = vst.msk [vmem:[%s145_s12 + $0x8] sm:$0xff] %vm666_vm11, %v664_v9 }
 0x126   : > { %v659_v1 = vpop.f32.mrb[8].mxu0 }
 0x127   : > { %v665_v2 = vmax.f32 %v575_v63, %v659_v1  ;;  %v815_v3 = vpop.f32.mrb[9].mxu0 }
 0x129   : > { %669 = vst.msk [vmem:[%s145_s12 + $0x10] sm:$0xff] %vm666_vm11, %v665_v2 }
 0x12a PF: > { %s12_s9 = sadd.s32 1, %s846_s9  }
 0x12b   : > { %p9_p5 = scmp.ge.s32.totalorder %s12_s9, 4  }
 0x12d   :  { %11 = sbr.rel (!%p9_p5) target bundleno = 1 (0x1), region = 60 }

</bundles_post_ra>
